<compile_context>
chip_gen: v7x
topology: tpu7x:2x2x1
jax: 0.10.0
libtpu: 0.0.40
codegen_flags: <defaults>
</compile_context>

<pallas_src>
import math
import numpy as np
import jax
import jax.numpy as jnp
from jax.experimental import pallas as pl
from jax.experimental.pallas import tpu as pltpu


# ---------------------------------------------------------------------------
# Host-side anchor generation (same semantics as the PyTorch module's
# generate_anchor; pure numpy, not a device op).
# ---------------------------------------------------------------------------
def generate_anchor(feature_height, feature_width, image_size,
                    ratio=(1,), anchor_size=(4, 8, 16, 24, 32, 48, 64, 80, 96)):
    anchor_base = []
    for ratio_t in ratio:
        for anchor_size_t in anchor_size:
            h = anchor_size_t * math.sqrt(ratio_t)
            w = anchor_size_t * math.sqrt(1 / ratio_t)
            anchor_base.append([-h / 2, -w / 2, h / 2, w / 2])
    anchor_base = np.array(anchor_base)
    K = len(ratio) * len(anchor_size)
    image_height, image_width = image_size
    stride_x = image_height / feature_height
    stride_y = image_width / feature_width
    anchors = np.zeros([feature_height, feature_width, K, 4])
    for i in range(feature_height):
        for j in range(feature_width):
            x = i * stride_x + stride_x / 2
            y = j * stride_y + stride_y / 2
            anchors[i, j] = anchor_base + np.array([x, y, x, y])
    return anchors.reshape([-1, 4])


# ---------------------------------------------------------------------------
# Pallas kernel: whole image in one invocation, channels-x-pixels layout.
#   x_ref      : (9*C + 1, H*W)   transposed im2col + ones row (bias fold)
#   wmid_ref   : (M, 9*C + 1)     3x3 conv weights (bias as last column)
#   wheads_ref : (6K, M)          fused heads: [delta(4K) | bg(K) | fg(K)]
#   bheads_ref : (6K, 1)          fused head biases
#   heads_ref  : (6K, H*W)        raw head outputs (lane-dense)
#   fg_ref     : (K, H*W)         per-anchor foreground softmax probability
# ---------------------------------------------------------------------------
def make_rpn_kernel(K):
    def kernel(x_ref, wmid_ref, wheads_ref, bheads_ref, heads_ref, fg_ref):
        # 3x3 conv (im2col) + folded bias + ReLU : (M, H*W)
        mid = jnp.maximum(
            jnp.dot(wmid_ref[...], x_ref[...],
                    preferred_element_type=jnp.float32),
            0.0)

        # fused 1x1 heads: rows [0:4K]=delta, [4K:5K]=bg score, [5K:6K]=fg score
        heads = jnp.dot(wheads_ref[...], mid,
                        preferred_element_type=jnp.float32) + bheads_ref[...]
        heads_ref[...] = heads

        # softmax over (bg, fg) per anchor (numerically stable, 2-way)
        bg = heads[4 * K:5 * K, :]
        fg = heads[5 * K:6 * K, :]
        m = jnp.maximum(bg, fg)
        e_bg = jnp.exp(bg - m)
        e_fg = jnp.exp(fg - m)
        fg_ref[...] = e_fg * pl.reciprocal(e_bg + e_fg, approx=True)

    return kernel


# ---------------------------------------------------------------------------
# Wrapper: mirrors rpn.forward (batch fixed to 1).
# ---------------------------------------------------------------------------
def rpn_forward(features, image_size, params,
                ratio=(1,), anchor_size=(4, 8, 16, 24, 32, 48, 64, 80, 96)):
    wmid, bmid, wd, bd, ws, bs = params
    N, C, H, W = features.shape
    assert N == 1
    K = len(ratio) * len(anchor_size)
    M = wmid.shape[-1]
    NP = H * W

    # --- layout plumbing (wrapper-side, pure data movement) -----------------
    # NCHW -> HWC, zero-pad spatial dims by 1 (Conv2d padding=1).
    x = jnp.transpose(features[0], (1, 2, 0)).astype(jnp.float32)   # (H, W, C)
    xpad = jnp.pad(x, ((1, 1), (1, 1), (0, 0)))                     # (H+2, W+2, C)

    # im2col, transposed to channels x pixels: row = tap*C + c, col = h*W + w.
    taps = [xpad[dh:dh + H, dw:dw + W, :] for dh in range(3) for dw in range(3)]
    xcol = jnp.stack(taps, axis=0)                                  # (9, H, W, C)
    xcol_t = jnp.transpose(xcol, (0, 3, 1, 2)).reshape(9 * C, NP)   # (9C, H*W)
    xcol_aug = jnp.concatenate(
        [xcol_t, jnp.ones((1, NP), jnp.float32)], axis=0)           # (9C+1, H*W)

    # 3x3 conv weight (9, C, M) -> (M, 9C); fold bias as an extra column.
    wmid_t = jnp.transpose(wmid.reshape(9 * C, M))                  # (M, 9C)
    wmid_aug = jnp.concatenate(
        [wmid_t, bmid.reshape(M, 1)], axis=1)                       # (M, 9C+1)

    # Fused heads, transposed; de-interleave score bg/fg columns on the host:
    # rows [0:4K] = delta channels, [4K:5K] = bg (even score channels),
    # [5K:6K] = fg (odd score channels).
    wd_t = jnp.transpose(wd)                                        # (4K, M)
    ws_t = jnp.transpose(ws)                                        # (2K, M)
    wheads_t = jnp.concatenate([wd_t, ws_t[0::2], ws_t[1::2]], axis=0)  # (6K, M)
    bheads = jnp.concatenate(
        [bd.reshape(-1), bs.reshape(-1)[0::2], bs.reshape(-1)[1::2]]
    ).reshape(6 * K, 1)                                             # (6K, 1)

    # --- single-invocation pallas_call (no grid; everything resident) -------
    kernel = make_rpn_kernel(K)
    vmem_spec = pl.BlockSpec(memory_space=pltpu.MemorySpace.VMEM)

    heads_t, fg_t = pl.pallas_call(
        kernel,
        out_shape=(
            jax.ShapeDtypeStruct((6 * K, NP), jnp.float32),   # lane-dense (.., 256)
            jax.ShapeDtypeStruct((K, NP), jnp.float32),
        ),
        in_specs=[vmem_spec, vmem_spec, vmem_spec, vmem_spec],
        out_specs=(vmem_spec, vmem_spec),
    )(xcol_aug, wmid_aug, wheads_t, bheads)

    # --- back to the PyTorch output layouts (wrapper glue) ------------------
    # delta: channels in original order -> permute(0,2,3,1).view(H*W*K, 4)
    delta = jnp.transpose(heads_t[:4 * K, :]).reshape(NP * K, 4)
    # score: re-interleave (bg_k, fg_k) pairs -> view(H*W*K, 2)
    bg_hw = jnp.transpose(heads_t[4 * K:5 * K, :])                  # (H*W, K)
    fg_hw = jnp.transpose(heads_t[5 * K:6 * K, :])                  # (H*W, K)
    score = jnp.stack([bg_hw, fg_hw], axis=-1).reshape(NP * K, 2)
    # foreground softmax probability -> (1, H*W*K), pixel-major then anchor
    score_softmax_fg = jnp.transpose(fg_t).reshape(1, NP * K)

    anchor = generate_anchor(H, W, image_size, list(ratio), list(anchor_size))
    return delta, score, score_softmax_fg, anchor


# ---------------------------------------------------------------------------
# Plain-JAX reference (numerical sanity check of the kernel).
# ---------------------------------------------------------------------------
def rpn_forward_ref(features, params, K):
    wmid, bmid, wd, bd, ws, bs = params
    _, C, H, W = features.shape
    M = wmid.shape[-1]
    x = jnp.transpose(features[0], (1, 2, 0)).astype(jnp.float32)
    xpad = jnp.pad(x, ((1, 1), (1, 1), (0, 0)))
    mid = jnp.zeros((H, W, M), jnp.float32)
    for dh in range(3):
        for dw in range(3):
            mid = mid + jnp.einsum('hwc,cm->hwm',
                                   xpad[dh:dh + H, dw:dw + W, :],
                                   wmid[dh * 3 + dw])
    mid = jnp.maximum(mid + bmid[0], 0.0)
    d = jnp.einsum('hwm,mo->hwo', mid, wd) + bd[0]
    s = jnp.einsum('hwm,mo->hwo', mid, ws) + bs[0]
    fg = jax.nn.softmax(s.reshape(H, W, K, 2), axis=-1)[..., 1]
    return d.reshape(-1, 4), s.reshape(-1, 2), fg.reshape(1, -1)


if __name__ == "__main__":
    key = jax.random.PRNGKey(0)
    in_channel, mid_channel = 4, 32
    H = W = 16
    image_size = (64, 64)
    anchor_size = (4, 8, 16, 24, 32, 48, 64, 80, 96)
    K = len(anchor_size)  # ratio=[1]

    k1, k2, k3, k4 = jax.random.split(key, 4)
    features = jax.random.normal(k1, (1, in_channel, H, W), dtype=jnp.float32)

    # Deterministic parameter init mirroring _normal_init(m, 0, 0.01) + zero bias.
    # 3x3 conv weight stored as (kh*kw, C_in, C_out); 1x1 convs as (C_in, C_out).
    wmid = 0.01 * jax.random.normal(k2, (9, in_channel, mid_channel), jnp.float32)
    bmid = jnp.zeros((1, mid_channel), jnp.float32)
    wd = 0.01 * jax.random.normal(k3, (mid_channel, 4 * K), jnp.float32)
    bd = jnp.zeros((1, 4 * K), jnp.float32)
    ws = 0.01 * jax.random.normal(k4, (mid_channel, 2 * K), jnp.float32)
    bs = jnp.zeros((1, 2 * K), jnp.float32)
    params = (wmid, bmid, wd, bd, ws, bs)

    delta, score, score_fg, anchor = rpn_forward(features, image_size, params,
                                                 ratio=(1,), anchor_size=anchor_size)
    jax.block_until_ready((delta, score, score_fg))

    # Shape contract from the PyTorch module.
    assert delta.shape == (H * W * K, 4)
    assert score.shape == (H * W * K, 2)
    assert score_fg.shape == (1, H * W * K)
    assert anchor.shape == (H * W * K, 4)

    # Numerical sanity check vs. pure-JAX reference.
    d_ref, s_ref, fg_ref = rpn_forward_ref(features, params, K)
    np.testing.assert_allclose(np.asarray(delta), np.asarray(d_ref),
                               rtol=1e-4, atol=1e-5)
    np.testing.assert_allclose(np.asarray(score), np.asarray(s_ref),
                               rtol=1e-4, atol=1e-5)
    # fg uses the EUP approx reciprocal -> slightly looser tolerance.
    np.testing.assert_allclose(np.asarray(score_fg), np.asarray(fg_ref),
                               rtol=1e-3, atol=1e-3)

    print("KERNEL_OK")
</pallas_src>

<mosaic_0001>
module attributes {stable_mosaic.version = 11 : i64} {
  func.func @kernel(%arg0: memref<37x256xf32, #tpu.memory_space<vmem>>, %arg1: memref<32x37xf32, #tpu.memory_space<vmem>>, %arg2: memref<54x32xf32, #tpu.memory_space<vmem>>, %arg3: memref<54x1xf32, #tpu.memory_space<vmem>>, %arg4: memref<54x256xf32, #tpu.memory_space<vmem>>, %arg5: memref<9x256xf32, #tpu.memory_space<vmem>>) attributes {dimension_semantics = [], scalar_prefetch = 0 : i64, scratch_operands = 0 : i64, tpu.core_type = #tpu.core_type<tc>} {
    %c0 = arith.constant 0 : index
    %c0_0 = arith.constant 0 : index
    %0 = vector.load %arg1[%c0, %c0_0] : memref<32x37xf32, #tpu.memory_space<vmem>>, vector<32x37xf32>
    %c0_1 = arith.constant 0 : index
    %c0_2 = arith.constant 0 : index
    %1 = vector.load %arg0[%c0_1, %c0_2] : memref<37x256xf32, #tpu.memory_space<vmem>>, vector<37x256xf32>
    %cst = arith.constant dense<0.000000e+00> : vector<32x256xf32>
    %2 = tpu.matmul %0, %1, %cst {dimension_numbers = #tpu.dot_dimension_numbers<[1], [0], [0], [1], [0, 0, 1, 1], [], []>} : vector<32x37xf32>, vector<37x256xf32>, vector<32x256xf32> -> vector<32x256xf32>
    %cst_3 = arith.constant 0.000000e+00 : f32
    %3 = vector.broadcast %cst_3 : f32 to vector<32x256xf32>
    %4 = arith.maximumf %2, %3 : vector<32x256xf32>
    %c0_4 = arith.constant 0 : index
    %c0_5 = arith.constant 0 : index
    %5 = vector.load %arg2[%c0_4, %c0_5] : memref<54x32xf32, #tpu.memory_space<vmem>>, vector<54x32xf32>
    %cst_6 = arith.constant dense<0.000000e+00> : vector<54x256xf32>
    %6 = tpu.matmul %5, %4, %cst_6 {dimension_numbers = #tpu.dot_dimension_numbers<[1], [0], [0], [1], [0, 0, 1, 1], [], []>} : vector<54x32xf32>, vector<32x256xf32>, vector<54x256xf32> -> vector<54x256xf32>
    %c0_7 = arith.constant 0 : index
    %c0_8 = arith.constant 0 : index
    %7 = vector.load %arg3[%c0_7, %c0_8] : memref<54x1xf32, #tpu.memory_space<vmem>>, vector<54x1xf32>
    %8 = vector.broadcast %7 : vector<54x1xf32> to vector<54x256xf32>
    %9 = arith.addf %6, %8 : vector<54x256xf32>
    %c0_9 = arith.constant 0 : index
    %c0_10 = arith.constant 0 : index
    %10 = vector.load %arg4[%c0_9, %c0_10] : memref<54x256xf32, #tpu.memory_space<vmem>>, vector<54x256xf32>
    tpu.vector_store %arg4[%c0_9, %c0_10], %9 {strides = array<i32>} : memref<54x256xf32, #tpu.memory_space<vmem>>, vector<54x256xf32>,
    %11 = vector.extract_strided_slice %9 {offsets = [36, 0], sizes = [9, 256], strides = [1, 1]} : vector<54x256xf32> to vector<9x256xf32>
    %12 = vector.extract_strided_slice %9 {offsets = [45, 0], sizes = [9, 256], strides = [1, 1]} : vector<54x256xf32> to vector<9x256xf32>
    %13 = arith.maximumf %11, %12 : vector<9x256xf32>
    %14 = arith.subf %11, %13 : vector<9x256xf32>
    %15 = math.exp %14 : vector<9x256xf32>
    %16 = arith.subf %12, %13 : vector<9x256xf32>
    %17 = math.exp %16 : vector<9x256xf32>
    %18 = arith.addf %15, %17 : vector<9x256xf32>
    %19 = tpu.reciprocal %18 {approx = true} : vector<9x256xf32> -> vector<9x256xf32>
    %20 = arith.mulf %17, %19 : vector<9x256xf32>
    %c0_11 = arith.constant 0 : index
    %c0_12 = arith.constant 0 : index
    %21 = vector.load %arg5[%c0_11, %c0_12] : memref<9x256xf32, #tpu.memory_space<vmem>>, vector<9x256xf32>
    tpu.vector_store %arg5[%c0_11, %c0_12], %20 {strides = array<i32>} : memref<9x256xf32, #tpu.memory_space<vmem>>, vector<9x256xf32>,
    return
  }
}

</mosaic_0001>

<bundles_post_ra>
// kernel: tpu_custom_call.1
= control target key start
LH: loop header
LB: loop body
LE: loop exit
PB: predicated region body
PF: predicated region fallthrough
CT: control target
= control target key end

     0   :  { %11 = vsyncpa [#allocation3], 0  ;;  %v606_v7 = vmov 0.0   ;;  %s794_s0 = inlined_call_operand.vmem [shape: f32[37,256], index: 0, kind: input, shape index: {}]   ;;  %s795_s1 = inlined_call_operand.vmem [shape: f32[32,37], index: 1, kind: input, shape index: {}]   ;;  %s796_s2 = inlined_call_operand.vmem [shape: f32[54,32], index: 2, kind: input, shape index: {}]   ;;  %s797_s3 = inlined_call_operand.vmem [shape: f32[54,1], index: 3, kind: input, shape index: {}]   ;;  %s798_s4 = inlined_call_operand.hbm [shape: f32[54,256], index: 4, kind: output, shape index: {0}]   ;;  %s799_s5 = inlined_call_operand.hbm [shape: f32[9,256], index: 5, kind: output, shape index: {1}]  }
   0x1   :  { %v26_v0 = vld [vmem:[%s794_s0 + $0x8] sm:$0xff]  ;;  %v28_v1 = vld [vmem:[%s794_s0 + $0x18] sm:$0xff]  ;;  %v25_v2 = vld [vmem:[%s794_s0] sm:$0xff]  ;;  %119 = vmatprep.mubr.f32.mxu0 %v606_v7  ;;  %293 = vmatprep.mubr.f32.mxu1 %v606_v7 }
   0x2   :  { %v506_v3 = vpack.c.bf16 %v28_v1, %v26_v0  ;;  %v27_v4 = vld [vmem:[%s794_s0 + $0x10] sm:$0xff]  ;;  %v30_v5 = vld [vmem:[%s794_s0 + $0x28] sm:$0xff]  ;;  %v32_v6 = vld [vmem:[%s794_s0 + $0x38] sm:$0xff] }
   0x3   :  { %v508_v8 = vpack.c.bf16 %v27_v4, %v25_v2  ;;  %v510_v9 = vpack.c.bf16 %v32_v6, %v30_v5  ;;  %v29_v10 = vld [vmem:[%s794_s0 + $0x20] sm:$0xff]  ;;  %v31_v11 = vld [vmem:[%s794_s0 + $0x30] sm:$0xff] }
   0x4   :  { %507 = vmatprep.subr.bf16.mxu0 %v506_v3  ;;  %v512_v12 = vpack.c.bf16 %v31_v11, %v29_v10 }
   0x5   :  { %509 = vmatpush1.bf16.msra.mxu0 %v508_v8 }
   0x6   :  { %12 = vsyncpa [#allocation5], 0  ;;  %511 = vmatprep.subr.bf16.mxu0 %v510_v9  ;;  %v34_v13 = vld [vmem:[%s794_s0 + $0x48] sm:$0x1f]  ;;  %vm48_vm0 = vcmask 1044480   ;;  %v21_v15 = vld [vmem:[%s795_s1] sm:$0xff] }
   0x7   :  { %v33_v14 = vld [vmem:[%s794_s0 + $0x40] sm:$0x1f]  ;;  %vm35_vm1 = vcmask 302080   ;;  %v22_v16 = vld [vmem:[%s795_s1 + $0x8] sm:$0xff]  ;;  %v23_v17 = vld [vmem:[%s795_s1 + $0x10] sm:$0xff]  ;;  %v607_v20 = vmov 0  }
   0x8   :  { %v24_v18 = vld [vmem:[%s795_s1 + $0x18] sm:$0xff]  ;;  %v164_v19 = vld [vmem:[%s797_s3 + $0x28] sm:$0xff]  ;;  %532 = vset.pattern.permute.xlu0 %v607_v20  ;;  %533 = vset.pattern.permute.xlu1 %v607_v20  ;;  %v163_v21 = vld [vmem:[%s797_s3 + $0x20] sm:$0xff]  ;;  %vm201_vm2 = vcmask 261120   ;;  %vm348_vm3 = vcmask 1046528  }
   0x9   :  { %513 = vmatpush1.bf16.msra.mxu0 %v512_v12  ;;  %193 = vperm.xlu0 %532, %v164_v19   ;;  %v165_v22 = vld [vmem:[%s797_s3 + $0x30] sm:$0x3f]  ;;  %v159_v23 = vld [vmem:[%s797_s3] sm:$0xff]  ;;  %v160_v24 = vld [vmem:[%s797_s3 + $0x8] sm:$0xff] }
   0xa   :  { %493 = vmatprep.subr.msk.mxu0 %vm48_vm0, %v34_v13  ;;  %188 = vperm.xlu1 %533, %v163_v21   ;;  %v161_v25 = vld [vmem:[%s797_s3 + $0x10] sm:$0xff]  ;;  %v162_v26 = vld [vmem:[%s797_s3 + $0x18] sm:$0xff]  ;;  %v153_v47 = vld [vmem:[%s796_s2 + $0x8] sm:$0xff] }
   0xb   :  { %v152_v48 = vld [vmem:[%s796_s2] sm:$0xff]  ;;  %v154_v49 = vld [vmem:[%s796_s2 + $0x10] sm:$0xff]  ;;  %v155_v50 = vld [vmem:[%s796_s2 + $0x18] sm:$0xff] }
   0xc   :  { %v156_v51 = vld [vmem:[%s796_s2 + $0x20] sm:$0xff]  ;;  %v157_v52 = vld [vmem:[%s796_s2 + $0x28] sm:$0xff]  ;;  %v158_v53 = vld [vmem:[%s796_s2 + $0x30] sm:$0x3f]  ;;  %s608_s2 = smov [#allocation2]  }
   0xd   :  { %494 = vmatpush1.msk.msra.mxu0 %vm48_vm0, %v33_v14  ;;  %198 = vperm.xlu0 %532, %v165_v22   ;;  %s466_s20 = sshll.u32 %s608_s2, 4  ;;  %s467_s20 = int_to_ptr.vmem [resolvable:$true] %s466_s20 }
   0xe   :  { %495 = vmatmul.mubr.msk.f32.vlgmr.msra.gmra.mrb[0].mxu0 %vm35_vm1, %v21_v15  ;;  %168 = vperm.xlu1 %533, %v159_v23   ;;  %s558_s21 = scalar_lea.vmem %s467_s20, 1792  ;;  %p563_p1 = scmp.lt.s32.totalorder %s467_s20, %s467_s20 }
   0xf   :  { %125 = vmatprep.mubr.f32.mxu0 %v606_v7  ;;  %p559_p0 = scmp.ne.s32.totalorder %s467_s20, %s558_s21  ;;  %p564_p2 = scmp.lt.s32.totalorder %s558_s21, %s558_s21 }
  0x11   :  { %173 = vperm.xlu0 %532, %v160_v24   ;;  %p565_p3 = por %p564_p2, %p563_p1 }
  0x12   :  { %496 = vmatmul.mubr.msk.f32.gmra.mrb[2].mxu0 %vm35_vm1, %v22_v16  ;;  %178 = vperm.xlu1 %533, %v161_v25  }
  0x13   :  { %131 = vmatprep.mubr.f32.mxu0 %v606_v7  ;;  %p566_p4 = pnand %p565_p3, %p559_p0 }
  0x15   :  { %183 = vperm.xlu0 %532, %v162_v26  }
  0x16   :  { %497 = vmatmul.mubr.msk.f32.gmra.mrb[4].mxu0 %vm35_vm1, %v23_v17 }
  0x17   :  { %137 = vmatprep.mubr.f32.mxu0 %v606_v7 }
  0x1a   :  { %498 = vmatmul.mubr.msk.f32.gmra.mrb[6].mxu0 %vm35_vm1, %v24_v18 }
  0x1b   :  { %287 = vmatprep.mubr.f32.mxu0 %v606_v7 }
  0x88   :  { %v194_v54 = vpop.permute.xlu0 %193 }
  0x89   :  { %v189_v55 = vpop.permute.xlu1 %188 }
  0x8c   :  { %v199_v56 = vpop.permute.xlu0 %198 }
  0x8d   :  { %v169_v57 = vpop.permute.xlu1 %168 }
  0x90   :  { %v174_v58 = vpop.permute.xlu0 %173 }
  0x91   :  { %v179_v2 = vpop.permute.xlu1 %178 }
  0x94   :  { %v184_v8 = vpop.permute.xlu0 %183 }
  0xe1   :  { %v121_v27 = vpop.f32.mrb[0].mxu0 }
  0xe2   :  { %v123_v28 = vpop.f32.mrb[1].mxu0  ;;  %v144_v30 = vmax.f32 %v121_v27, 0.0 }
  0xe3   :  { %v145_v33 = vmax.f32 %v123_v28, 0.0 }
  0xe5   :  { %v127_v29 = vpop.f32.mrb[2].mxu0 }
  0xe6   :  { %v146_v31 = vmax.f32 %v127_v29, 0.0  ;;  %v129_v32 = vpop.f32.mrb[3].mxu0 }
  0xe7   :  { %v147_v34 = vmax.f32 %v129_v32, 0.0 }
  0xe8   :  { %v516_v35 = vpack.c.bf16 %v146_v31, %v144_v30 }
  0xe9   :  { %v514_v36 = vpack.c.bf16 %v147_v34, %v145_v33  ;;  %v133_v37 = vpop.f32.mrb[4].mxu0 }
  0xea   :  { %v135_v38 = vpop.f32.mrb[5].mxu0  ;;  %v148_v40 = vmax.f32 %v133_v37, 0.0 }
  0xeb   :  { %515 = vmatprep.subr.bf16.mxu0 %v514_v36  ;;  %522 = vmatprep.subr.bf16.mxu1 %v514_v36  ;;  %v149_v43 = vmax.f32 %v135_v38, 0.0 }
  0xec   :  { %517 = vmatpush1.bf16.msra.mxu0 %v516_v35  ;;  %524 = vmatpush1.bf16.msra.mxu1 %v516_v35 }
  0xed   :  { %v139_v39 = vpop.f32.mrb[6].mxu0 }
  0xee   :  { %v150_v41 = vmax.f32 %v139_v39, 0.0  ;;  %v141_v42 = vpop.f32.mrb[7].mxu0 }
  0xef   :  { %v151_v44 = vmax.f32 %v141_v42, 0.0 }
  0xf0   :  { %v520_v45 = vpack.c.bf16 %v150_v41, %v148_v40 }
  0xf1   :  { %v518_v46 = vpack.c.bf16 %v151_v44, %v149_v43 }
  0xf3   :  { %519 = vmatprep.subr.bf16.mxu0 %v518_v46  ;;  %523 = vmatprep.subr.bf16.mxu1 %v518_v46 }
  0xf4   :  { %521 = vmatpush1.bf16.msra.mxu0 %v520_v45  ;;  %525 = vmatpush1.bf16.msra.mxu1 %v520_v45 }
  0xf7   :  { %500 = vmatmul.mubr.msk.f32.vlgmr.msra.gmra.mrb[0].mxu1 %vm201_vm2, %v153_v47  ;;  %499 = vmatmul.mubr.msk.f32.vlgmr.msra.gmra.mrb[8].mxu0 %vm201_vm2, %v152_v48 }
  0xf8   :  { %299 = vmatprep.mubr.f32.mxu1 %v606_v7 }
  0xfb   :  { %501 = vmatmul.mubr.msk.f32.gmra.mrb[2].mxu1 %vm201_vm2, %v154_v49 }
  0xfc   :  { %305 = vmatprep.mubr.f32.mxu1 %v606_v7 }
  0xff   :  { %502 = vmatmul.mubr.msk.f32.gmra.mrb[4].mxu1 %vm201_vm2, %v155_v50 }
 0x100   :  { %311 = vmatprep.mubr.f32.mxu1 %v606_v7 }
 0x103   :  { %503 = vmatmul.mubr.msk.f32.gmra.mrb[6].mxu1 %vm201_vm2, %v156_v51 }
 0x104   :  { %317 = vmatprep.mubr.f32.mxu1 %v606_v7 }
 0x107   :  { %504 = vmatmul.mubr.msk.f32.gmra.mrb[8].mxu1 %vm201_vm2, %v157_v52 }
 0x108   :  { %323 = vmatprep.mubr.f32.mxu1 %v606_v7 }
 0x10b   :  { %505 = vmatmul.mubr.msk.f32.gmra.mrb[10].mxu1 %vm201_vm2, %v158_v53 }
 0x1ca   :  { %v295_v59 = vpop.f32.mrb[0].mxu1  ;;  %v289_v60 = vpop.f32.mrb[8].mxu0 }
 0x1cb   :  { %v296_v61 = vadd.f32 %v295_v59, %v174_v58  ;;  %v297_v62 = vpop.f32.mrb[1].mxu1  ;;  %v290_v63 = vadd.f32 %v289_v60, %v169_v57  ;;  %v291_v0 = vpop.f32.mrb[9].mxu0 }
 0x1cc   :  { %v298_v1 = vadd.f32 %v297_v62, %v174_v58  ;;  %v292_v3 = vadd.f32 %v291_v0, %v169_v57 }
 0x1cd   :  { %332 = vst [vmem:[#allocation2 + $0x10] sm:$0xff] %v296_v61  ;;  %330 = vst [vmem:[#allocation2] sm:$0xff] %v290_v63 }
 0x1ce   :  { %333 = vst [vmem:[#allocation2 + $0x18] sm:$0xff] %v298_v1  ;;  %v301_v4 = vpop.f32.mrb[2].mxu1  ;;  %331 = vst [vmem:[#allocation2 + $0x8] sm:$0xff] %v292_v3 }
 0x1cf   :  { %v302_v5 = vadd.f32 %v301_v4, %v179_v2  ;;  %v303_v6 = vpop.f32.mrb[3].mxu1 }
 0x1d0   :  { %v304_v7 = vadd.f32 %v303_v6, %v179_v2 }
 0x1d1   :  { %334 = vst [vmem:[#allocation2 + $0x20] sm:$0xff] %v302_v5 }
 0x1d2   :  { %335 = vst [vmem:[#allocation2 + $0x28] sm:$0xff] %v304_v7  ;;  %v307_v9 = vpop.f32.mrb[4].mxu1 }
 0x1d3   :  { %v308_v10 = vadd.f32 %v307_v9, %v184_v8  ;;  %v309_v11 = vpop.f32.mrb[5].mxu1 }
 0x1d4   :  { %v310_v12 = vadd.f32 %v309_v11, %v184_v8 }
 0x1d5   :  { %336 = vst [vmem:[#allocation2 + $0x30] sm:$0xff] %v308_v10 }
 0x1d6   :  { %337 = vst [vmem:[#allocation2 + $0x38] sm:$0xff] %v310_v12  ;;  %v313_v13 = vpop.f32.mrb[6].mxu1 }
 0x1d7   :  { %v314_v14 = vadd.f32 %v313_v13, %v189_v55  ;;  %v315_v15 = vpop.f32.mrb[7].mxu1 }
 0x1d8   :  { %v744_v16 = vadd.f32 %v315_v15, %v189_v55 }
 0x1d9   :  { %338 = vst [vmem:[#allocation2 + $0x40] sm:$0xff] %v314_v14 }
 0x1da   :  { %339 = vst [vmem:[#allocation2 + $0x48] sm:$0xff] %v744_v16  ;;  %v319_v17 = vpop.f32.mrb[8].mxu1 }
 0x1db   :  { %v320_v18 = vadd.f32 %v319_v17, %v194_v54  ;;  %v321_v19 = vpop.f32.mrb[9].mxu1 }
 0x1dc   :  { %v747_v20 = vadd.f32 %v321_v19, %v194_v54 }
 0x1dd   :  { %340 = vst [vmem:[#allocation2 + $0x50] sm:$0xff] %v320_v18  ;;  %v349_v25 = vrot.slane %v320_v18, 1 }
 0x1de   :  { %341 = vst [vmem:[#allocation2 + $0x58] sm:$0xff] %v747_v20  ;;  %v325_v21 = vpop.f32.mrb[10].mxu1  ;;  %v352_v27 = vrot.slane %v747_v20, 1 }
 0x1df   :  { %v326_v22 = vadd.f32 %v325_v21, %v199_v56  ;;  %v327_v23 = vpop.f32.mrb[11].mxu1 }
 0x1e0   :  { %v328_v24 = vadd.f32 %v327_v23, %v199_v56 }
 0x1e1   :  { %342 = vst [vmem:[#allocation2 + $0x60] sm:$0x3f] %v326_v22  ;;  %v350_v26 = vrot.slane %v326_v22, 1 }
 0x1e2   :  { %343 = vst [vmem:[#allocation2 + $0x68] sm:$0x3f] %v328_v24  ;;  %v353_v28 = vrot.slane %v328_v24, 1 }
 0x1e3   :  { %v351_v29 = vsel %vm348_vm3, %v349_v25, %v350_v26  ;;  %v361_v30 = vmax.f32 %v320_v18, %v350_v26 }
 0x1e4   :  { %569 = shalt.err (!%p566_p4)
}
 0x1e5   :  { %s570_s24 = scalar_lea.hbm %s798_s4, 1792 }
 0x1e6   :  { %p571_p5 = scmp.ne.s32.totalorder %s798_s4, %s570_s24  ;;  %p574_p6 = scmp.lt.u32.totalorder %s570_s24, %s798_s4 }
 0x1e8   :  { %p576_p7 = pnand %p574_p6, %p571_p5 }
 0x1ea   :  { %579 = shalt.err (!%p576_p7)
}
 0x1eb   :  { %s609_s28 = smov 256   ;;  %s610_s29 = smov 16   ;;  %v359_v31 = vmax.f32 %v314_v14, %v351_v29  ;;  %v354_v32 = vsel %vm348_vm3, %v352_v27, %v353_v28  ;;  %v362_v33 = vmax.f32 %v747_v20, %v353_v28  ;;  %v365_v34 = vsub.f32 %v320_v18, %v361_v30 }
 0x1ec   :  { %472 = dma.vmem_to_hbm [thread:$0]  %s467_s20, 1792, %s798_s4, [#allocation3], %s609_s28, %s609_s28, %s610_s29   ;;  %vm379_vm4 = vcmask 1040384   ;;  %v382_v35 = vrot.slane %v361_v30, 7  ;;  %v360_v36 = vmax.f32 %v744_v16, %v354_v32  ;;  %vm446_vm5 = vcmask 1042432  }
 0x1ed   :  { %v363_v37 = vsub.f32 %v314_v14, %v359_v31  ;;  %v380_v38 = vrot.slane %v359_v31, 7  ;;  %v366_v39 = vsub.f32 %v747_v20, %v362_v33  ;;  %v384_v40 = vrot.slane %v362_v33, 7  ;;  %s611_s4 = smov [#allocation4]  }
 0x1ee   :  { %v371_v41 = vmul.f32 1.442695, %v365_v34  ;;  %v364_v42 = vsub.f32 %v744_v16, %v360_v36  ;;  %v381_v43 = vrot.slane %v360_v36, 7  ;;  %s478_s7 = sshll.u32 %s611_s4, 4  ;;  %s479_s7 = int_to_ptr.vmem [resolvable:$true] %s478_s7 }
 0x1ef   :  { %v383_v44 = vsel %vm379_vm4, %v380_v38, %v382_v35  ;;  %v390_v45 = vsub.f32 %v320_v18, %v380_v38  ;;  %v367_v48 = vmul.f32 1.442695, %v363_v37  ;;  %v373_v55 = vmul.f32 1.442695, %v366_v39  ;;  %s580_s3 = scalar_lea.vmem %s479_s7, 512  ;;  %p585_p9 = scmp.lt.s32.totalorder %s479_s7, %s479_s7 }
 0x1f0   :  { %v392_v46 = vsub.f32 %v326_v22, %v383_v44  ;;  %v385_v47 = vsel %vm379_vm4, %v381_v43, %v384_v40  ;;  %v391_v50 = vsub.f32 %v747_v20, %v381_v43  ;;  %534 = vpow2.f32 %v371_v41  ;;  %p581_p8 = scmp.ne.s32.totalorder %s479_s7, %s580_s3  ;;  %p586_p10 = scmp.lt.s32.totalorder %s580_s3, %s580_s3 }
 0x1f1   :  { %v394_v49 = vmul.f32 1.442695, %v390_v45  ;;  %v393_v51 = vsub.f32 %v328_v24, %v385_v47  ;;  %v369_v56 = vmul.f32 1.442695, %v364_v42 }
 0x1f2   :  { %v398_v52 = vmul.f32 1.442695, %v392_v46  ;;  %v396_v53 = vmul.f32 1.442695, %v391_v50  ;;  %p587_p11 = por %p586_p10, %p585_p9 }
 0x1f3   :  { %536 = vpow2.f32 %v394_v49  ;;  %v400_v54 = vmul.f32 1.442695, %v393_v51 }
 0x1f4   :  { %538 = vpow2.f32 %v398_v52  ;;  %p588_p12 = pnand %p587_p11, %p581_p8 }
 0x1f5   :  { %540 = vpow2.f32 %v367_v48 }
 0x1f6   :  { %542 = vpow2.f32 %v396_v53 }
 0x1f7   :  { %544 = vpow2.f32 %v400_v54 }
 0x1f8   :  { %546 = vpow2.f32 %v373_v55 }
 0x1f9   :  { %548 = vpow2.f32 %v369_v56 }
 0x1fa   :  { %v535_v57 = vpop.eup %534 }
 0x1fd   :  { %v537_v58 = vpop.eup %536 }
 0x1fe   :  { %v539_v59 = vpop.eup %538  ;;  %v406_v60 = vrot.slane %v537_v58, 1 }
 0x1ff   :  { %v541_v61 = vpop.eup %540  ;;  %v407_v62 = vrot.slane %v539_v59, 1 }
 0x200   :  { %v543_v63 = vpop.eup %542 }
 0x201   :  { %v545_v0 = vpop.eup %544  ;;  %v408_v1 = vsel %vm348_vm3, %v406_v60, %v407_v62  ;;  %v418_v2 = vadd.f32 %v535_v57, %v407_v62  ;;  %v409_v3 = vrot.slane %v543_v63, 1 }
 0x202   :  { %v416_v4 = vadd.f32 %v541_v61, %v408_v1  ;;  %v410_v5 = vrot.slane %v545_v0, 1  ;;  %v547_v6 = vpop.eup %546 }
 0x203   :  { %550 = vrcp.f32 %v418_v2  ;;  %v549_v7 = vpop.eup %548 }
 0x204   :  { %552 = vrcp.f32 %v416_v4  ;;  %v411_v8 = vsel %vm348_vm3, %v409_v3, %v410_v5  ;;  %v419_v9 = vadd.f32 %v547_v6, %v410_v5 }
 0x205   :  { %v417_v10 = vadd.f32 %v549_v7, %v411_v8 }
 0x206   :  { %554 = vrcp.f32 %v419_v9 }
 0x207   :  { %556 = vrcp.f32 %v417_v10 }
 0x20d   :  { %v551_v11 = vpop.eup %550 }
 0x20e   :  { %v553_v12 = vpop.eup %552  ;;  %v430_v13 = vrot.slane %v551_v11, 7 }
 0x20f   :  { %v428_v14 = vrot.slane %v553_v12, 7 }
 0x210   :  { %v555_v15 = vpop.eup %554 }
 0x211   :  { %v557_v16 = vpop.eup %556  ;;  %v431_v17 = vsel %vm379_vm4, %v428_v14, %v430_v13  ;;  %v438_v18 = vmul.f32 %v537_v58, %v428_v14  ;;  %v432_v19 = vrot.slane %v555_v15, 7 }
 0x212   :  { %v440_v20 = vmul.f32 %v539_v59, %v431_v17  ;;  %v429_v21 = vrot.slane %v557_v16, 7 }
 0x213   :  { %v447_v22 = vrot.slane %v438_v18, 5 }
 0x214   :  { %v448_v23 = vrot.slane %v440_v20, 5  ;;  %v433_v24 = vsel %vm379_vm4, %v429_v21, %v432_v19  ;;  %v439_v25 = vmul.f32 %v543_v63, %v429_v21 }
 0x215   :  { %v441_v26 = vmul.f32 %v545_v0, %v433_v24 }
 0x216   :  { %459 = vst [vmem:[#allocation4 + $0x10] sm:$0x1] %v448_v23  ;;  %v449_v27 = vsel %vm446_vm5, %v447_v22, %v448_v23  ;;  %v450_v28 = vrot.slane %v439_v25, 5 }
 0x217   :  { %v451_v29 = vrot.slane %v441_v26, 5  ;;  %457 = vst [vmem:[#allocation4] sm:$0xff] %v449_v27 }
 0x219   :  { %v452_v30 = vsel %vm446_vm5, %v450_v28, %v451_v29  ;;  %460 = vst [vmem:[#allocation4 + $0x18] sm:$0x1] %v451_v29 }
 0x21a   :  { %458 = vst [vmem:[#allocation4 + $0x8] sm:$0xff] %v452_v30 }
 0x21b   :  { %591 = shalt.err (!%p588_p12)
}
 0x21c   :  { %s592_s10 = scalar_lea.hbm %s799_s5, 512 }
 0x21d   :  { %p593_p13 = scmp.ne.s32.totalorder %s799_s5, %s592_s10  ;;  %p596_p0 = scmp.lt.u32.totalorder %s592_s10, %s799_s5 }
 0x21f   :  { %p598_p1 = pnand %p596_p0, %p593_p13 }
 0x221   :  { %601 = shalt.err (!%p598_p1)
}
 0x222   :  { %484 = dma.vmem_to_hbm [thread:$0]  %s479_s7, 512, %s799_s5, [#allocation5], %s609_s28, %s609_s28, %s610_s29  }
 0x223   :  { %602 = dma.done.wait [#allocation3], 1792  }
 0x224   :  { %603 = vsyncadd [#allocation3], 4294965504 }
 0x225   :  { %604 = dma.done.wait [#allocation5], 512  }
 0x226   :  { %605 = vsyncadd [#allocation5], 4294966784 }
 0x227   :  { %491 = vsyncpa [#allocation3], 1 }
 0x228   :  { %492 = vsyncpa [#allocation5], 1 }

</bundles_post_ra>
